<compile_context>
chip_gen: v6e
topology: v6e:2x2x1
jax: 0.10.0
libtpu: 0.0.40
codegen_flags: <defaults>
</compile_context>

<pallas_src>
import math

import jax
import jax.numpy as jnp
from jax.experimental import pallas as pl
from jax.experimental.pallas import tpu as pltpu


def _round_up(n, m):
    return ((n + m - 1) // m) * m


# --------------------------------- the kernel --------------------------------
def _pos_emb_kernel(x_ref, fp_ref, o_ref):
    # x_ref:  (tb, 1)  timesteps, one per sublane row
    # fp_ref: (2, C)   row 0 = [freqs | freqs], row 1 = [0 ... 0 | pi/2 ... pi/2]
    # o_ref:  (tb, C)  output block, channels lane-dense
    x = x_ref[...].astype(jnp.float32)          # (tb, 1)
    f_ext = fp_ref[0:1, :]                      # (1, C)  duplicated frequencies
    phase = fp_ref[1:2, :]                      # (1, C)  0 / pi/2 phase offsets
    arg = x * f_ext + phase                     # broadcast outer product + phase, (tb, C)
    # cos(t) == sin(t + pi/2): one full-width EUP sin replaces sin + cos + lane concat.
    o_ref[...] = jnp.sin(arg).astype(o_ref.dtype)  # single full-width store


# ------------------------------- host-side glue -------------------------------
def positional_embedding(x, freqs, *, block_b=2048, out_dtype=None):
    """x: (B,) timesteps; freqs: (C//2,) buffer. Returns (B, C) in x.dtype (or out_dtype)."""
    b = x.shape[0]
    half = freqs.shape[0]
    c = 2 * half
    out_dtype = x.dtype if out_dtype is None else out_dtype

    # Host-side constants: extended freqs + phase packed into a single (2, C) block
    # (one constant input stream; its index_map is constant so it is DMA'd only once).
    f32 = freqs.astype(jnp.float32)
    f_ext = jnp.concatenate([f32, f32], axis=0)
    phase = jnp.concatenate(
        [jnp.zeros((half,), jnp.float32),
         jnp.full((half,), jnp.pi / 2, jnp.float32)], axis=0)
    fp = jnp.stack([f_ext, phase], axis=0)      # (2, C)

    # Batch tile selection:
    #   * block_b=2048 -> 1 MiB f32 output tile at C=128 (good HBM-roofline utilization),
    #   * capped at ~ceil(B/2) rounded to a sublane multiple so the 'parallel' grid axis
    #     has >= 2 steps (both TensorCores get work on v7x; no-op on v5e/v6e).
    if b <= 16:
        tb = b                                  # single full-extent block (exact array dims)
    else:
        tb = max(8, min(block_b, _round_up(pl.cdiv(b, 2), 8)))
    grid = (pl.cdiv(b, tb),)

    x2 = x.reshape(b, 1)                        # sublanes = batch, lanes = 1 (VMEM-padded to 128)

    # VMEM per buffer: output tile tb*C*4 + x's padded (tb,128)*4 tile + tiny fp block.
    # At block_b=2048, C=128 that is ~2 MiB per buffer, ~4 MiB double-buffered: fits the
    # default scoped-VMEM limit on every generation (v5e 16 MiB). Raise vmem_limit_bytes
    # via pltpu.CompilerParams if block_b is pushed past ~4096.
    return pl.pallas_call(
        _pos_emb_kernel,
        out_shape=jax.ShapeDtypeStruct((b, c), out_dtype),
        grid_spec=pltpu.PrefetchScalarGridSpec(
            num_scalar_prefetch=0,
            grid=grid,
            in_specs=[
                pl.BlockSpec((tb, 1), lambda i: (i, 0)),
                pl.BlockSpec((2, c), lambda i: (0, 0)),   # constant block, fetched once
            ],
            out_specs=pl.BlockSpec((tb, c), lambda i: (i, 0)),
        ),
        compiler_params=pltpu.CompilerParams(
            dimension_semantics=("parallel",)),   # batch rows are independent
    )(x2, fp)


def make_freqs(num_channels):
    # Mirrors the PyTorch buffer: exp(arange(half) * -(log(10) / (half - 1))).
    # NOTE: the spec module really uses log(10) (not the usual log(10000)); kept as-is.
    half = num_channels // 2
    emb = math.log(10.0) / max(half - 1, 1)     # guard num_channels == 2
    return jnp.exp(jnp.arange(half, dtype=jnp.float32) * -emb)


# ----------------------------------- reference ---------------------------------
def ref_forward(x, freqs):
    y = x.astype(jnp.float32)
    y = jnp.outer(y, freqs.astype(jnp.float32))
    y = jnp.concatenate([jnp.sin(y), jnp.cos(y)], axis=1)
    return y.astype(x.dtype)


# ------------------------------------ main ------------------------------------
if __name__ == "__main__":
    key = jax.random.PRNGKey(0)
    B, NUM_CHANNELS = 64, 128                   # C=128 -> full 128-lane output rows
    x = jax.random.uniform(key, (B,), jnp.float32, 0.0, 100.0)  # timestep-like values
    freqs = make_freqs(NUM_CHANNELS)

    out = jax.block_until_ready(positional_embedding(x, freqs))
    ref = ref_forward(x, freqs)

    assert out.shape == (B, NUM_CHANNELS)
    err = float(jnp.max(jnp.abs(out.astype(jnp.float32) - ref.astype(jnp.float32))))
    if err > 1e-4:
        raise AssertionError(f"Pallas kernel mismatch vs reference: max abs err = {err}")
    print("KERNEL_OK")
</pallas_src>

<mosaic_0001>
module attributes {stable_mosaic.version = 11 : i64} {
  func.func @_pos_emb_kernel(%arg0: i32, %arg1: memref<32x1xf32, #tpu.memory_space<vmem>>, %arg2: memref<2x128xf32, #tpu.memory_space<vmem>>, %arg3: memref<32x128xf32, #tpu.memory_space<vmem>>) attributes {dimension_semantics = [#tpu.dimension_semantics<parallel>], iteration_bounds = array<i64: 2>, scalar_prefetch = 0 : i64, scratch_operands = 0 : i64, tpu.core_type = #tpu.core_type<tc>, window_params = [{transform_indices = @transform_0, window_bounds = array<i64: 32, 1>}, {pipeline_mode = #tpu.pipeline_mode<synchronous>, transform_indices = @transform_1, window_bounds = array<i64: 2, 128>}, {transform_indices = @transform_2, window_bounds = array<i64: 32, 128>}]} {
    %c0 = arith.constant 0 : index
    %c0_0 = arith.constant 0 : index
    %0 = vector.load %arg1[%c0, %c0_0] : memref<32x1xf32, #tpu.memory_space<vmem>>, vector<32x1xf32>
    %c0_1 = arith.constant 0 : index
    %c0_2 = arith.constant 0 : index
    %1 = vector.load %arg2[%c0_1, %c0_2] : memref<2x128xf32, #tpu.memory_space<vmem>>, vector<1x128xf32>
    %c1 = arith.constant 1 : index
    %c0_3 = arith.constant 0 : index
    %2 = vector.load %arg2[%c1, %c0_3] : memref<2x128xf32, #tpu.memory_space<vmem>>, vector<1x128xf32>
    %3 = vector.broadcast %0 : vector<32x1xf32> to vector<32x128xf32>
    %4 = vector.broadcast %1 : vector<1x128xf32> to vector<32x128xf32>
    %5 = arith.mulf %3, %4 : vector<32x128xf32>
    %6 = vector.broadcast %2 : vector<1x128xf32> to vector<32x128xf32>
    %7 = arith.addf %5, %6 : vector<32x128xf32>
    %8 = math.sin %7 : vector<32x128xf32>
    %c0_4 = arith.constant 0 : index
    %c0_5 = arith.constant 0 : index
    %9 = vector.load %arg3[%c0_4, %c0_5] : memref<32x128xf32, #tpu.memory_space<vmem>>, vector<32x128xf32>
    tpu.vector_store %arg3[%c0_4, %c0_5], %8 {strides = array<i32>} : memref<32x128xf32, #tpu.memory_space<vmem>>, vector<32x128xf32>,
    return
  }
  func.func @transform_0(%arg0: i32) -> (i32, i32) {
    %c0_i32 = arith.constant 0 : i32
    %c0_i32_0 = arith.constant 0 : i32
    return %arg0, %c0_i32 : i32, i32
  }
  func.func @transform_1(%arg0: i32) -> (i32, i32) {
    %c0_i32 = arith.constant 0 : i32
    %c0_i32_0 = arith.constant 0 : i32
    %c0_i32_1 = arith.constant 0 : i32
    return %c0_i32, %c0_i32_0 : i32, i32
  }
  func.func @transform_2(%arg0: i32) -> (i32, i32) {
    %c0_i32 = arith.constant 0 : i32
    %c0_i32_0 = arith.constant 0 : i32
    return %arg0, %c0_i32 : i32, i32
  }
}

</mosaic_0001>

<bundles_post_ra>
// kernel: tpu_custom_call.1
= control target key start
LH: loop header
LB: loop body
LE: loop exit
PB: predicated region body
PF: predicated region fallthrough
CT: control target
= control target key end

     0   :  { %7 = vsyncpa [#allocation3], 0  ;;  %s1281_s0 = inlined_call_operand.vmem [shape: f32[64,1], index: 0, kind: input, shape index: {}]   ;;  %s1282_s1 = inlined_call_operand.vmem [shape: f32[2,128], index: 1, kind: input, shape index: {}]   ;;  %s1283_s2 = inlined_call_operand.hbm [shape: f32[64,128], index: 2, kind: output, shape index: {}]  }
   0x1   :  { %9 = vsyncpa [#allocation3 + $0x1], 0  ;;  %s883_s9 = smov 0   ;;  %s885_s10 = smov 0  }
   0x2   :  { %s887_s11 = smov 0   ;;  %s889_s12 = smov 0  }
   0x3 LB: > { %s904_s13 = sadd.s32 4294967295, %s856_s12   ;;  %s683_s14 = sadd.s32 4294967294, %s856_s12   ;;  %s856_s12 = sphi %s889_s12, %s1293_s12   ;;  %s852_s11 = sphi %s887_s11, %s1292_s11   ;;  %s848_s10 = sphi %s885_s10, %s1291_s10   ;;  %s844_s9 = sphi %s883_s9, %s1290_s9  }
   0x4   : > { %s908_s15 = sadd.s32 1, %s856_s12   ;;  %s69_s16 = sadd.s32 1, %s852_s11 }
   0x5   : > { %s66_s17 = ssub.s32 %s856_s12, %s908_s15  ;;  %p79_p0 = scmp.ne.s32.totalorder %s852_s11, %s848_s10 }
   0x6   : > { %p67_p1 = scmp.eq.s32.totalorder %s66_s17, 0  ;;  %p80_p2 = scmp.eq.s32.totalorder %s904_s13, 1 }
   0x7   : > { %p85_p3 = scmp.ne.s32.totalorder %s848_s10, %s844_s9  ;;  %p86_p4 = scmp.eq.s32.totalorder %s683_s14, 1 }
   0x8   : > { %s919_s18 = scalar_select %p67_p1, %s852_s11, %s69_s16  }
   0x9   : > { %p921_p5 = por %p80_p2, %p79_p0  ;;  %p925_p6 = por %p86_p4, %p85_p3 }
   0xa   : > { %p686_p7 = scmp.ge.s32.totalorder %s856_s12, 1  ;;  %p116_p8 = scmp.lt.s32.totalorder %s856_s12, 3 }
   0xc   : > { %p117_p9 = pnand %p686_p7, %p116_p8 }
   0xd   : > { %s688_s21 = sshll.u32 (!%p117_p9), %s904_s13, 2  ;;  %s135_s30 = sand.u32 (!%p117_p9), 1, %s848_s10  }
   0xe   : > { %120 = sbr.rel (%p117_p9) target bundleno = 307 (0x133), region = 28  ;;  %p139_p10 = scmp.lt.s32.totalorder (!%p117_p9), %s688_s21, 7 }
   0xf   : > { %s687_s3 = sshll.u32 (!%p117_p9), %s135_s30, 5  ;;  %s713_s5 = sshll.u32 (!%p117_p9), %s904_s13, 9 }
  0x10   : > { %s1205_s4 = scalar_lea.vmem (!%p117_p9), [#allocation2], %s687_s3  ;;  %s1233_s14 = scalar_lea.hbm (!%p117_p9), %s1283_s2, %s713_s5 }
  0x11   : > { %s621_s6 = sshll.u32 (!%p117_p9), %s1205_s4, 4  ;;  %s1241_s13 = scalar_lea.sflag (!%p117_p9), [#allocation3], %s135_s30  ;;  %s1235_s6 = int_to_ptr.vmem [resolvable:$true] %s621_s6 }
  0x12   : > { %s796_s16 = scalar_lea.vmem (!%p117_p9), %s1235_s6, 512  ;;  %s865_s17 = smov (!%p117_p9), [#allocation2]  }
  0x13   : > { %v858_v0 = vmov 0   ;;  %s1295_s21 = smov (!%p139_p10, %s688_s21), 7  ;;  %v938_v5 = vld [vmem:[%s1282_s1] ss:$0 sm:$0xff]  ;;  %v943_v6 = vld [vmem:[%s1282_s1 + $0x1] ss:$0 sm:$0xff]  ;;  %p797_p11 = scmp.ne.s32.totalorder %s1235_s6, %s796_s16 }
  0x14   : > { %779 = vset.pattern.permute.xlu1 %v858_v0  ;;  %778 = vset.pattern.permute.xlu0 %v858_v0  ;;  %s689_s22 = sshll.u32 %s1295_s21, 3  ;;  %v859_v40 = vmov 683565275   ;;  %v860_v44 = vmov 2475754826   ;;  %s800_s21 = sshll.u32 %s865_s17, 4  ;;  %s801_s21 = int_to_ptr.vmem [resolvable:$false] %s800_s21 }
  0x15   : > { %s142_s25 = scalar_lea.vmem %s1281_s0, %s689_s22  ;;  %v861_v46 = vmov 2131351028   ;;  %v862_v48 = vmov 2102212464   ;;  %v863_v50 = vmov 920167782   ;;  %p798_p12 = pnand %p797_p11, %p921_p5 }
  0x16   : > { %v147_v1 = vld [vmem:[%s142_s25 + $0x10] sm:$0xff]  ;;  %v145_v2 = vld [vmem:[%s142_s25] sm:$0xff]  ;;  %v148_v3 = vld [vmem:[%s142_s25 + $0x18] sm:$0xff]  ;;  %v864_v57 = vmov 1326507024   ;;  %s802_s22 = scalar_lea.vmem %s801_s21, 1024  ;;  %p803_p0 = scmp.lt.s32.totalorder %s1235_s6, %s801_s21 }
  0x17   : > { %163 = vperm.xlu1 %779, %v147_v1   ;;  %153 = vperm.xlu0 %778, %v145_v2   ;;  %v146_v4 = vld [vmem:[%s142_s25 + $0x8] sm:$0xff]  ;;  %p799_p13 = pneg %p798_p12  ;;  %p804_p1 = scmp.lt.s32.totalorder %s802_s22, %s796_s16 }
  0x19   : > { %p805_p2 = por %p804_p1, %p803_p0 }
  0x1b   : > { %168 = vperm.xlu1 %779, %v148_v3   ;;  %158 = vperm.xlu0 %778, %v146_v4   ;;  %p806_p3 = pnand %p805_p2, %p799_p13 }
  0x92   : > { %v164_v7 = vpop.permute.xlu1 %163  ;;  %v154_v8 = vpop.permute.xlu0 %153 }
  0x93   : > { %v177_v9 = vmul.f32 %v938_v5, %v164_v7  ;;  %v175_v10 = vmul.f32 %v938_v5, %v154_v8 }
  0x95   : > { %v948_v11 = vadd.f32 %v943_v6, %v177_v9  ;;  %v951_v12 = vadd.f32 %v943_v6, %v175_v10 }
  0x96   : > { %v169_v13 = vpop.permute.xlu1 %168 }
  0x97   : > { %v395_v14 = vand.u32 2147483647, %v948_v11  ;;  %v398_v15 = vand.u32 2139095040, %v948_v11  ;;  %v187_v16 = vand.u32 2147483647, %v951_v12  ;;  %v190_v17 = vand.u32 2139095040, %v951_v12 }
  0x98   : > { %v178_v19 = vmul.f32 %v938_v5, %v169_v13  ;;  %vm397_vm13 = vcmp.lt.s32.totalorder %v948_v11, 0 }
  0x99   : > { %v399_v18 = vshrl.u32 %v398_v15, 23  ;;  %v402_v20 = vand.u32 8388607, %v395_v14  ;;  %v191_v21 = vshrl.u32 %v190_v17, 23  ;;  %v194_v22 = vand.u32 8388607, %v187_v16 }
  0x9a   : > { %v963_v24 = vadd.f32 %v943_v6, %v178_v19 }
  0x9b   : > { %v700_v23 = vadd.s32 4294967169, %v399_v18  ;;  %v692_v25 = vadd.s32 4294967169, %v191_v21  ;;  %v403_v27 = vor.u32 8388608, %v402_v20  ;;  %v195_v28 = vor.u32 8388608, %v194_v22 }
  0x9c   : > { %v502_v30 = vand.u32 2139095040, %v963_v24 }
  0x9d   : > { %v405_v26 = vadd.s32 1, %v700_v23  ;;  %v197_v29 = vadd.s32 1, %v692_v25  ;;  %v966_v36 = vshll.u32 %v403_v27, 8  ;;  %v970_v38 = vshll.u32 %v195_v28, 8 }
  0x9e   : > { %v503_v32 = vshrl.u32 %v502_v30, 23 }
  0x9f   : > { %vm406_vm0 = vcmp.gt.s32.totalorder %v405_v26, 0  ;;  %vm198_vm1 = vcmp.gt.s32.totalorder %v197_v29, 0 }
  0xa0   : > { %v407_v31 = vsel %vm406_vm0, %v405_v26, 0  ;;  %v199_v35 = vsel %vm198_vm1, %v197_v29, 0  ;;  %v973_v43 = vadd.s32 4294967169, %v503_v32 }
  0xa1   : > { %v408_v33 = vshrl.u32 %v407_v31, 5  ;;  %v409_v34 = vand.u32 31, %v407_v31  ;;  %v968_v37 = vshrl.u32 %v199_v35, 5  ;;  %v201_v42 = vand.u32 31, %v199_v35 }
  0xa3   : > { %v410_v39 = vsub.s32 32, %v409_v34  ;;  %v412_v41 = vshll.u32 %v859_v40, %v409_v34  ;;  %v415_v45 = vshll.u32 %v860_v44, %v409_v34  ;;  %v418_v47 = vshll.u32 %v861_v46, %v409_v34 }
  0xa4   : > { %v421_v49 = vshll.u32 %v862_v48, %v409_v34  ;;  %v424_v51 = vshll.u32 %v863_v50, %v409_v34  ;;  %vm427_vm2 = vcmp.lt.s32.totalorder %v408_v33, 1  ;;  %vm428_vm3 = vcmp.lt.s32.totalorder %v408_v33, 2 }
  0xa5   : > { %v413_v52 = vshrl.u32 %v860_v44, %v410_v39  ;;  %v416_v53 = vshrl.u32 %v861_v46, %v410_v39  ;;  %v419_v54 = vshrl.u32 %v862_v48, %v410_v39  ;;  %v411_v55 = vshrl.u32 %v859_v40, %v410_v39 }
  0xa6   : > { %v422_v56 = vshrl.u32 %v863_v50, %v410_v39  ;;  %v425_v58 = vshrl.u32 %v864_v57, %v410_v39  ;;  %v202_v62 = vsub.s32 32, %v201_v42  ;;  %vm429_vm4 = vcmp.lt.s32.totalorder %v408_v33, 3 }
  0xa7   : > { %v414_v59 = vor.u32 %v413_v52, %v412_v41  ;;  %v417_v60 = vor.u32 %v416_v53, %v415_v45  ;;  %v420_v61 = vor.u32 %v419_v54, %v418_v47  ;;  %vm430_vm5 = vcmp.lt.s32.totalorder %v408_v33, 4 }
  0xa8   : > { %v423_v63 = vor.u32 %v422_v56, %v421_v49  ;;  %v426_v0 = vor.u32 %v425_v58, %v424_v51  ;;  %v204_v10 = vshll.u32 %v859_v40, %v201_v42  ;;  %v205_v17 = vshrl.u32 %v860_v44, %v202_v62 }
  0xa9   : > { %v431_v1 = vsel %vm427_vm2, %v411_v55, %v414_v59  ;;  %v432_v2 = vsel %vm430_vm5, %v420_v61, 2102212464  ;;  %v435_v3 = vsel %vm427_vm2, %v414_v59, %v417_v60  ;;  %v439_v4 = vsel %vm427_vm2, %v417_v60, %v420_v61 }
  0xaa   : > { %v433_v7 = vsel %vm429_vm4, %v417_v60, %v432_v2  ;;  %v436_v8 = vsel %vm430_vm5, %v423_v63, 920167782  ;;  %v440_v9 = vsel %vm430_vm5, %v426_v0, 1326507024  ;;  %v207_v18 = vshll.u32 %v860_v44, %v201_v42  ;;  %v159_v0 = vpop.permute.xlu0 %158 }
  0xab   : > { %v437_v13 = vsel %vm429_vm4, %v420_v61, %v436_v8  ;;  %v441_v15 = vsel %vm429_vm4, %v423_v63, %v440_v9  ;;  %v434_v19 = vsel %vm428_vm3, %v431_v1, %v433_v7  ;;  %v208_v22 = vshrl.u32 %v861_v46, %v202_v62 }
  0xac   : > { %v438_v20 = vsel %vm428_vm3, %v435_v3, %v437_v13  ;;  %v442_v21 = vsel %vm428_vm3, %v439_v4, %v441_v15  ;;  %v206_v28 = vor.u32 %v205_v17, %v204_v10  ;;  %v210_v30 = vshll.u32 %v861_v46, %v201_v42 }
  0xad   : > { %v996_v23 = vmul.u32.u64.low %v966_v36, %v442_v21  ;;  %v997_v25 = vmul.u32.u64.high %v966_v36, %v442_v21, %v996_v23  ;;  %v1000_v26 = vmul.u32.u64.low %v966_v36, %v438_v20  ;;  %v1001_v27 = vmul.u32.u64.high %v966_v36, %v438_v20, %v1000_v26 }
  0xae   : > { %v209_v29 = vor.u32 %v208_v22, %v207_v18  ;;  %v211_v31 = vshrl.u32 %v862_v48, %v202_v62  ;;  %v203_v32 = vshrl.u32 %v859_v40, %v202_v62  ;;  %v213_v33 = vshll.u32 %v862_v48, %v201_v42 }
  0xaf   : > { %v214_v34 = vshrl.u32 %v863_v50, %v202_v62  ;;  %v217_v35 = vshrl.u32 %v864_v57, %v202_v62  ;;  %v450_v39 = vmul.u32 %v966_v36, %v434_v19  ;;  %v216_v45 = vshll.u32 %v863_v50, %v201_v42 }
  0xb0   : > { %v212_v41 = vor.u32 %v211_v31, %v210_v30  ;;  %vm219_vm6 = vcmp.lt.s32.totalorder %v968_v37, 1  ;;  %vm452_vm7 = vc.u32 %v997_v25, %v1000_v26  ;;  %v453_v47 = vadd.s32 1, %v1001_v27 }
  0xb1   : > { %v215_v49 = vor.u32 %v214_v34, %v213_v33  ;;  %vm220_vm8 = vcmp.lt.s32.totalorder %v968_v37, 2  ;;  %v218_v51 = vor.u32 %v217_v35, %v216_v45  ;;  %vm221_vm9 = vcmp.lt.s32.totalorder %v968_v37, 3 }
  0xb2   : > { %vm222_vm10 = vcmp.lt.s32.totalorder %v968_v37, 4  ;;  %v227_v52 = vsel %vm219_vm6, %v206_v28, %v209_v29  ;;  %v454_v36 = vsel %vm452_vm7, %v453_v47, %v1001_v27  ;;  %v231_v42 = vsel %vm219_vm6, %v209_v29, %v212_v41 }
  0xb3   : > { %v224_v53 = vsel %vm222_vm10, %v212_v41, 2102212464  ;;  %v228_v54 = vsel %vm222_vm10, %v215_v49, 920167782  ;;  %v455_v55 = vadd.s32 %v454_v36, %v450_v39  ;;  %v223_v56 = vsel %vm219_vm6, %v203_v32, %v206_v28 }
  0xb4   : > { %v229_v58 = vsel %vm221_vm9, %v212_v41, %v228_v54  ;;  %v232_v59 = vsel %vm222_vm10, %v218_v51, 1326507024  ;;  %v225_v60 = vsel %vm221_vm9, %v209_v29, %v224_v53  ;;  %v509_v63 = vadd.s32 1, %v973_v43 }
  0xb5   : > { %v230_v61 = vsel %vm220_vm8, %v227_v52, %v229_v58  ;;  %v233_v62 = vsel %vm221_vm9, %v215_v49, %v232_v59  ;;  %v456_v1 = vadd.s32 536870912, %v455_v55  ;;  %v499_v9 = vand.u32 2147483647, %v963_v24 }
  0xb6   : > { %v234_v2 = vsel %vm220_vm8, %v231_v42, %v233_v62  ;;  %v1024_v3 = vmul.u32.u64.low %v970_v38, %v230_v61  ;;  %v1025_v4 = vmul.u32.u64.high %v970_v38, %v230_v61, %v1024_v3  ;;  %vm510_vm11 = vcmp.gt.s32.totalorder %v509_v63, 0 }
  0xb7   : > { %v1029_v7 = vmul.u32.u64.low %v970_v38, %v234_v2  ;;  %v1030_v8 = vmul.u32.u64.high %v970_v38, %v234_v2, %v1029_v7  ;;  %v1033_v10 = vshrl.u32 %v456_v1, 30  ;;  %v226_v43 = vsel %vm220_vm8, %v223_v56, %v225_v60 }
  0xb8   : > { %v511_v13 = vsel %vm510_vm11, %v509_v63, 0  ;;  %v176_v15 = vmul.f32 %v938_v5, %v159_v0  ;;  %v245_v19 = vadd.s32 1, %v1025_v4  ;;  %v242_v20 = vmul.u32 %v970_v38, %v226_v43 }
  0xb9   : > { %v513_v17 = vand.u32 31, %v511_v13  ;;  %v458_v18 = vshll.u32 %v1033_v10, 30  ;;  %vm244_vm12 = vc.u32 %v1030_v8, %v1024_v3  ;;  %v506_v21 = vand.u32 8388607, %v499_v9 }
  0xba   : > { %v246_v37 = vsel %vm244_vm12, %v245_v19, %v1025_v4  ;;  %v1047_v27 = vadd.f32 %v943_v6, %v176_v15  ;;  %v451_v29 = vadd.s32 %v1000_v26, %v997_v25  ;;  %v512_v41 = vshrl.u32 %v511_v13, 5 }
  0xbb   : > { %v514_v22 = vsub.s32 32, %v513_v17  ;;  %v459_v23 = vsub.s32 %v455_v55, %v458_v18  ;;  %v247_v5 = vadd.s32 %v246_v37, %v242_v20  ;;  %v507_v31 = vor.u32 8388608, %v506_v21 }
  0xbc   : > { %v294_v35 = vand.u32 2139095040, %v1047_v27  ;;  %v516_v6 = vshll.u32 %v859_v40, %v513_v17  ;;  %v519_v25 = vshll.u32 %v860_v44, %v513_v17  ;;  %v522_v26 = vshll.u32 %v861_v46, %v513_v17 }
  0xbd   : > { %v461_v28 = vsub.s32 0, %v459_v23  ;;  %v248_v30 = vadd.s32 536870912, %v247_v5  ;;  %v517_v38 = vshrl.u32 %v860_v44, %v514_v22  ;;  %v520_v33 = vshrl.u32 %v861_v46, %v514_v22 }
  0xbe   : > { %v523_v34 = vshrl.u32 %v862_v48, %v514_v22  ;;  %v526_v45 = vshrl.u32 %v863_v50, %v514_v22  ;;  %v529_v49 = vshrl.u32 %v864_v57, %v514_v22  ;;  %v525_v36 = vshll.u32 %v862_v48, %v513_v17 }
  0xbf   : > { %v701_v32 = vmin.u32 %v461_v28, %v459_v23  ;;  %v1054_v39 = vshrl.u32 %v248_v30, 30  ;;  %v518_v52 = vor.u32 %v517_v38, %v516_v6  ;;  %v1063_v53 = vshll.u32 %v507_v31, 8 }
  0xc0   : > { %v521_v42 = vor.u32 %v520_v33, %v519_v25  ;;  %v524_v55 = vor.u32 %v523_v34, %v522_v26  ;;  %v528_v56 = vshll.u32 %v863_v50, %v513_v17  ;;  %v481_v58 = vsub.s32 4, %v1033_v10 }
  0xc1   : > { %v463_v47 = vclz %v701_v32  ;;  %v250_v51 = vshll.u32 %v1054_v39, 30  ;;  %v527_v60 = vor.u32 %v526_v45, %v525_v36  ;;  %v295_v61 = vshrl.u32 %v294_v35, 23 }
  0xc2   : > { %v515_v62 = vshrl.u32 %v859_v40, %v514_v22  ;;  %v530_v63 = vor.u32 %v529_v49, %v528_v56  ;;  %vm531_vm15 = vcmp.lt.s32.totalorder %v512_v41, 1  ;;  %vm533_vm0 = vcmp.lt.s32.totalorder %v512_v41, 3 }
  0xc3   : > { %v702_v54 = vadd.s32 4294967294, %v463_v47  ;;  %v1068_v59 = vsub.s32 %v247_v5, %v250_v51  ;;  %vm534_vm1 = vcmp.lt.s32.totalorder %v512_v41, 4  ;;  %vm1074_vm2 = vcmp.le.f32.partialorder %v395_v14, 0.7853982 }
  0xc4   : > { %v536_v43 = vsel %vm534_vm1, %v524_v55, 2102212464  ;;  %v539_v13 = vsel %vm531_vm15, %v518_v52, %v521_v42  ;;  %v540_v18 = vsel %vm534_vm1, %v527_v60, 920167782  ;;  %v543_v19 = vsel %vm531_vm15, %v521_v42, %v524_v55 }
  0xc5   : > { %vm703_vm14 = vcmp.lt.s32.totalorder %v702_v54, 0  ;;  %v253_v1 = vsub.s32 0, %v1068_v59  ;;  %v541_v22 = vsel %vm533_vm0, %v524_v55, %v540_v18  ;;  %v544_v37 = vsel %vm534_vm1, %v530_v63, 1326507024 }
  0xc6   : > { %v466_v0 = vsel %vm703_vm14, 0, %v702_v54  ;;  %vm532_vm3 = vcmp.lt.s32.totalorder %v512_v41, 2  ;;  %v535_v5 = vsel %vm531_vm15, %v515_v62, %v518_v52  ;;  %v537_v28 = vsel %vm533_vm0, %v521_v42, %v536_v43 }
  0xc7   : > { %v467_v4 = vsub.s32 32, %v466_v0  ;;  %v471_v7 = vsub.s32 4294967266, %v466_v0  ;;  %v468_v15 = vshll.u32 %v459_v23, %v466_v0  ;;  %v693_v17 = vmin.u32 %v253_v1, %v1068_v59 }
  0xc8   : > { %v542_v38 = vsel %vm532_vm3, %v539_v13, %v541_v22  ;;  %v545_v23 = vsel %vm533_vm0, %v527_v60, %v544_v37  ;;  %v482_v6 = vsel %vm397_vm13, %v481_v58, %v1033_v10  ;;  %v538_v25 = vsel %vm532_vm3, %v535_v5, %v537_v28 }
  0xc9   : > { %v469_v20 = vshrl.u32 %v451_v29, %v467_v4  ;;  %v472_v21 = vadd.s32 127, %v471_v7  ;;  %v255_v14 = vclz %v693_v17  ;;  %v546_v33 = vsel %vm532_vm3, %v543_v19, %v545_v23 }
  0xca   : > { %v1086_v34 = vmul.u32.u64.low %v1063_v53, %v542_v38  ;;  %v1087_v29 = vmul.u32.u64.high %v1063_v53, %v542_v38, %v1086_v34  ;;  %v1094_v45 = vmul.u32.u64.low %v1063_v53, %v546_v33  ;;  %v1095_v47 = vmul.u32.u64.high %v1063_v53, %v546_v33, %v1094_v45 }
  0xcb   : > { %v470_v30 = vor.u32 %v469_v20, %v468_v15  ;;  %v473_v31 = vshll.u32 %v472_v21, 23  ;;  %v694_v32 = vadd.s32 4294967294, %v255_v14  ;;  %v291_v41 = vand.u32 2147483647, %v1047_v27 }
  0xcc   : > { %v696_v26 = vadd.s32 4294967169, %v295_v61  ;;  %v243_v52 = vadd.s32 %v1024_v3, %v1030_v8  ;;  %v484_v54 = vsel %vm1074_vm2, 0, %v482_v6  ;;  %v557_v55 = vadd.s32 1, %v1087_v29 }
  0xcd   : > { %v474_v35 = vor.u32 4788187, %v473_v31  ;;  %vm695_vm4 = vcmp.lt.s32.totalorder %v694_v32, 0  ;;  %v477_v51 = vcvt.s32.f32 %v470_v30  ;;  %v554_v58 = vmul.u32 %v1063_v53, %v538_v25 }
  0xce   : > { %v258_v36 = vsel %vm695_vm4, 0, %v694_v32  ;;  %vm556_vm5 = vc.u32 %v1095_v47, %v1086_v34  ;;  %v301_v60 = vadd.s32 1, %v696_v26  ;;  %v273_v0 = vsub.s32 4, %v1054_v39 }
  0xcf   : > { %v475_v49 = vand.u32 2147483647, %v474_v35  ;;  %v259_v42 = vsub.s32 32, %v258_v36  ;;  %v263_v10 = vsub.s32 4294967266, %v258_v36  ;;  %v260_v61 = vshll.u32 %v1068_v59, %v258_v36 }
  0xd0   : > { %v558_v3 = vsel %vm556_vm5, %v557_v55, %v1087_v29  ;;  %vm302_vm6 = vcmp.gt.s32.totalorder %v301_v60, 0  ;;  %vm189_vm7 = vcmp.lt.s32.totalorder %v951_v12, 0  ;;  %v488_v17 = vadd.s32 3, %v484_v54 }
  0xd1   : > { %v478_v56 = vmul.f32 %v477_v51, %v475_v49  ;;  %v261_v62 = vshrl.u32 %v243_v52, %v259_v42  ;;  %v264_v63 = vadd.s32 127, %v263_v10  ;;  %v559_v1 = vadd.s32 %v558_v3, %v554_v58 }
  0xd2   : > { %v303_v43 = vsel %vm302_vm6, %v301_v60, 0  ;;  %v298_v19 = vand.u32 8388607, %v291_v41  ;;  %v274_v20 = vsel %vm189_vm7, %v273_v0, %v1054_v39  ;;  %vm1124_vm8 = vcmp.le.f32.partialorder %v187_v16, 0.7853982 }
  0xd3   : > { %v479_v8 = vxor.u32 2147483648, %v478_v56  ;;  %v262_v4 = vor.u32 %v261_v62, %v260_v61  ;;  %v265_v7 = vshll.u32 %v264_v63, 23  ;;  %v560_v13 = vadd.s32 536870912, %v559_v1 }
  0xd4   : > { %v305_v15 = vand.u32 31, %v303_v43  ;;  %v1129_v28 = vand.u32 3, %v488_v17  ;;  %v276_v39 = vsel %vm1124_vm8, 0, %v274_v20  ;;  %v299_v31 = vor.u32 8388608, %v298_v19 }
  0xd5   : > { %v480_v53 = vsel %vm397_vm13, %v479_v8, %v478_v56  ;;  %v266_v18 = vor.u32 4788187, %v265_v7  ;;  %v1120_v21 = vshrl.u32 %v560_v13, 30  ;;  %v269_v14 = vcvt.s32.f32 %v262_v4 }
  0xd6   : > { %v483_v59 = vsel %vm1074_vm2, %v948_v11, %v480_v53  ;;  %v306_v22 = vsub.s32 32, %v305_v15  ;;  %v1138_v29 = vshrl.u32 %v303_v43, 5  ;;  %v317_v6 = vshll.u32 %v862_v48, %v305_v15 }
  0xd7   : > { %780 = vcosq.f32 %v483_v59  ;;  %v267_v37 = vand.u32 2147483647, %v266_v18  ;;  %v562_v5 = vshll.u32 %v1120_v21, 30  ;;  %v308_v25 = vshll.u32 %v859_v40, %v305_v15 }
  0xd8   : > { %782 = vsinq.f32 %v483_v59  ;;  %v312_v23 = vshrl.u32 %v861_v46, %v306_v22  ;;  %v315_v32 = vshrl.u32 %v862_v48, %v306_v22  ;;  %v318_v16 = vshrl.u32 %v863_v50, %v306_v22 }
  0xd9   : > { %v270_v30 = vmul.f32 %v269_v14, %v267_v37  ;;  %v1133_v38 = vsub.s32 %v559_v1, %v562_v5  ;;  %v309_v35 = vshrl.u32 %v860_v44, %v306_v22  ;;  %v311_v26 = vshll.u32 %v860_v44, %v305_v15 }
  0xda   : > { %v314_v49 = vshll.u32 %v861_v46, %v305_v15  ;;  %v319_v52 = vor.u32 %v318_v16, %v317_v6  ;;  %v320_v36 = vshll.u32 %v863_v50, %v305_v15  ;;  %v321_v54 = vshrl.u32 %v864_v57, %v306_v22 }
  0xdb   : > { %v271_v33 = vxor.u32 2147483648, %v270_v30  ;;  %v565_v45 = vsub.s32 0, %v1133_v38  ;;  %vm491_vm9 = vcmp.eq.s32.totalorder %v1129_v28, 0  ;;  %v313_v44 = vor.u32 %v312_v23, %v311_v26 }
  0xdc   : > { %v316_v10 = vor.u32 %v315_v32, %v314_v49  ;;  %vm490_vm10 = vcmp.lt.s32.totalorder %v1129_v28, 2  ;;  %vm494_vm11 = vcmp.eq.s32.totalorder %v1129_v28, 2  ;;  %v310_v46 = vor.u32 %v309_v35, %v308_v25 }
  0xdd   : > { %v272_v51 = vsel %vm189_vm7, %v271_v33, %v270_v30  ;;  %v705_v42 = vmin.u32 %v565_v45, %v1133_v38  ;;  %v322_v50 = vor.u32 %v321_v54, %v320_v36  ;;  %vm487_vm12 = vweird.f32 %v948_v11 }
  0xde   : > { %v275_v48 = vsel %vm1124_vm8, %v951_v12, %v272_v51  ;;  %v280_v57 = vadd.s32 3, %v276_v39  ;;  %vm326_vm13 = vcmp.lt.s32.totalorder %v1138_v29, 4  ;;  %v555_v56 = vadd.s32 %v1086_v34, %v1095_v47 }
  0xdf   : > { %784 = vcosq.f32 %v275_v48  ;;  %v567_v55 = vclz %v705_v42  ;;  %vm323_vm14 = vcmp.lt.s32.totalorder %v1138_v29, 1  ;;  %v332_v58 = vsel %vm326_vm13, %v319_v52, 920167782 }
  0xe0   : > { %786 = vsinq.f32 %v275_v48  ;;  %v339_v60 = vshll.u32 %v299_v31, 8  ;;  %v307_v62 = vshrl.u32 %v859_v40, %v306_v22  ;;  %vm325_vm15 = vcmp.lt.s32.totalorder %v1138_v29, 3 }
  0xe1   : > { %v706_v61 = vadd.s32 4294967294, %v567_v55  ;;  %v335_v63 = vsel %vm323_vm14, %v313_v44, %v316_v10  ;;  %vm324_vm0 = vcmp.lt.s32.totalorder %v1138_v29, 2  ;;  %v331_v34 = vsel %vm323_vm14, %v310_v46, %v313_v44 }
  0xe2   : > { %v333_v47 = vsel %vm325_vm15, %v316_v10, %v332_v58  ;;  %v336_v8 = vsel %vm326_vm13, %v322_v50, 1326507024  ;;  %v328_v1 = vsel %vm326_vm13, %v316_v10, 2102212464  ;;  %v327_v53 = vsel %vm323_vm14, %v307_v62, %v310_v46 }
  0xe3   : > { %vm707_vm1 = vcmp.lt.s32.totalorder %v706_v61, 0  ;;  %v337_v4 = vsel %vm325_vm15, %v319_v52, %v336_v8  ;;  %v334_v18 = vsel %vm324_vm0, %v331_v34, %v333_v47  ;;  %v329_v20 = vsel %vm325_vm15, %v313_v44, %v328_v1 }
  0xe4   : > { %v781_v3 = vpop.eup %780  ;;  %v570_v43 = vsel %vm707_vm1, 0, %v706_v61  ;;  %v338_v13 = vsel %vm324_vm0, %v335_v63, %v337_v4  ;;  %v281_v31 = vand.u32 3, %v280_v57  ;;  %v330_v28 = vsel %vm324_vm0, %v327_v53, %v329_v20 }
  0xe5   : > { %v783_v0 = vpop.eup %782  ;;  %v495_v40 = vxor.u32 2147483648, %v781_v3  ;;  %v571_v59 = vsub.s32 32, %v570_v43  ;;  %v575_v17 = vsub.s32 4294967266, %v570_v43  ;;  %v572_v2 = vshll.u32 %v1133_v38, %v570_v43 }
  0xe6   : > { %v492_v7 = vxor.u32 2147483648, %v783_v0  ;;  %v1194_v22 = vmul.u32.u64.low %v339_v60, %v338_v13  ;;  %v1195_v37 = vmul.u32.u64.high %v339_v60, %v338_v13, %v1194_v22  ;;  %vm286_vm3 = vcmp.eq.s32.totalorder %v281_v31, 2 }
  0xe7   : > { %v496_v15 = vsel %vm494_vm11, %v495_v40, %v783_v0  ;;  %v573_v5 = vshrl.u32 %v555_v56, %v571_v59  ;;  %v576_v30 = vadd.s32 127, %v575_v17  ;;  %v346_v51 = vmul.u32 %v339_v60, %v330_v28 }
  0xe8   : > { %v493_v19 = vsel %vm491_vm9, %v781_v3, %v492_v7  ;;  %v1202_v23 = vmul.u32.u64.low %v339_v60, %v334_v18  ;;  %v1203_v32 = vmul.u32.u64.high %v339_v60, %v334_v18, %v1202_v23  ;;  %vm283_vm4 = vcmp.eq.s32.totalorder %v281_v31, 0 }
  0xe9   : > { %v497_v14 = vsel %vm490_vm10, %v493_v19, %v496_v15  ;;  %v574_v16 = vor.u32 %v573_v5, %v572_v2  ;;  %v577_v33 = vshll.u32 %v576_v30, 23  ;;  %vm282_vm5 = vcmp.lt.s32.totalorder %v281_v31, 2 }
  0xea   : > { %v498_v39 = vsel %vm487_vm12, nan, %v497_v14  ;;  %vm348_vm2 = vc.u32 %v1195_v37, %v1202_v23  ;;  %v349_v45 = vadd.s32 1, %v1203_v32  ;;  %vm279_vm6 = vweird.f32 %v951_v12 }
  0xeb   : > { %605 = vst [vmem:[%s1205_s4 + $0x10] sm:$0xff] %v498_v39  ;;  %v578_v38 = vor.u32 4788187, %v577_v33  ;;  %v581_v49 = vcvt.s32.f32 %v574_v16  ;;  %vm501_vm7 = vcmp.lt.s32.totalorder %v963_v24, 0  ;;  %v585_v50 = vsub.s32 4, %v1120_v21 }
  0xec   : > { %v785_v35 = vpop.eup %784  ;;  %v350_v36 = vsel %vm348_vm2, %v349_v45, %v1203_v32  ;;  %vm500_vm8 = vcmp.le.f32.partialorder %v499_v9, 0.7853982  ;;  %v347_v4 = vadd.s32 %v1202_v23, %v1195_v37  ;;  %vm591_vm13 = vweird.f32 %v963_v24 }
  0xed   : > { %v787_v6 = vpop.eup %786  ;;  %v287_v11 = vxor.u32 2147483648, %v785_v35  ;;  %v579_v26 = vand.u32 2147483647, %v578_v38  ;;  %v351_v48 = vadd.s32 %v350_v36, %v346_v51  ;;  %v586_v12 = vsel %vm501_vm7, %v585_v50, %v1120_v21 }
  0xee   : > { %v284_v25 = vxor.u32 2147483648, %v787_v6  ;;  %v588_v61 = vsel %vm500_vm8, 0, %v586_v12  ;;  %vm293_vm14 = vcmp.lt.s32.totalorder %v1047_v27, 0  ;;  %vm292_vm15 = vcmp.le.f32.partialorder %v291_v41, 0.7853982 }
  0xef   : > { %v288_v52 = vsel %vm286_vm3, %v287_v11, %v787_v6  ;;  %v582_v54 = vmul.f32 %v581_v49, %v579_v26  ;;  %v352_v46 = vadd.s32 536870912, %v351_v48  ;;  %v592_v3 = vadd.s32 3, %v588_v61 }
  0xf0   : > { %v285_v29 = vsel %vm283_vm4, %v785_v35, %v284_v25  ;;  %vm383_vm3 = vweird.f32 %v1047_v27 }
  0xf1   : > { %v289_v42 = vsel %vm282_vm5, %v285_v29, %v288_v52  ;;  %v583_v10 = vxor.u32 2147483648, %v582_v54  ;;  %v353_v55 = vshrl.u32 %v352_v46, 30  ;;  %v593_v8 = vand.u32 3, %v592_v3 }
  0xf2   : > { %v290_v44 = vsel %vm279_vm6, nan, %v289_v42 }
  0xf3   : > { %603 = vst [vmem:[%s1205_s4] sm:$0xff] %v290_v44  ;;  %v584_v57 = vsel %vm501_vm7, %v583_v10, %v582_v54  ;;  %v354_v58 = vshll.u32 %v353_v55, 30  ;;  %vm595_vm10 = vcmp.eq.s32.totalorder %v593_v8, 0  ;;  %vm598_vm11 = vcmp.eq.s32.totalorder %v593_v8, 2 }
  0xf4   : > { %v587_v56 = vsel %vm500_vm8, %v963_v24, %v584_v57  ;;  %vm594_vm12 = vcmp.lt.s32.totalorder %v593_v8, 2  ;;  %v377_v39 = vsub.s32 4, %v353_v55 }
  0xf5   : > { %788 = vcosq.f32 %v587_v56  ;;  %v355_v60 = vsub.s32 %v351_v48, %v354_v58 }
  0xf6   : > { %790 = vsinq.f32 %v587_v56  ;;  %v378_v23 = vsel %vm293_vm14, %v377_v39, %v353_v55 }
  0xf7   : > { %v357_v62 = vsub.s32 0, %v355_v60  ;;  %v380_v32 = vsel %vm292_vm15, 0, %v378_v23 }
  0xf8   : > { %v384_v16 = vadd.s32 3, %v380_v32 }
  0xf9   : > { %v697_v63 = vmin.u32 %v357_v62, %v355_v60 }
  0xfa   : > { %v385_v33 = vand.u32 3, %v384_v16 }
  0xfb   : > { %v359_v34 = vclz %v697_v63 }
  0xfc   : > { %vm390_vm0 = vcmp.eq.s32.totalorder %v385_v33, 2  ;;  %vm387_vm1 = vcmp.eq.s32.totalorder %v385_v33, 0  ;;  %vm386_vm2 = vcmp.lt.s32.totalorder %v385_v33, 2 }
  0xfd   : > { %v698_v47 = vadd.s32 4294967294, %v359_v34 }
  0xff   : > { %vm699_vm9 = vcmp.lt.s32.totalorder %v698_v47, 0 }
 0x100   : > { %v362_v9 = vsel %vm699_vm9, 0, %v698_v47 }
 0x101   : > { %v363_v7 = vsub.s32 32, %v362_v9  ;;  %v367_v43 = vsub.s32 4294967266, %v362_v9  ;;  %v364_v13 = vshll.u32 %v355_v60, %v362_v9 }
 0x102   : > { %v789_v0 = vpop.eup %788 }
 0x103   : > { %v791_v40 = vpop.eup %790  ;;  %v599_v1 = vxor.u32 2147483648, %v789_v0  ;;  %v365_v15 = vshrl.u32 %v347_v4, %v363_v7  ;;  %v368_v59 = vadd.s32 127, %v367_v43 }
 0x104   : > { %v596_v21 = vxor.u32 2147483648, %v791_v40 }
 0x105   : > { %v600_v53 = vsel %vm598_vm11, %v599_v1, %v791_v40  ;;  %v366_v19 = vor.u32 %v365_v15, %v364_v13  ;;  %v369_v20 = vshll.u32 %v368_v59, 23 }
 0x106   : > { %v597_v17 = vsel %vm595_vm10, %v789_v0, %v596_v21 }
 0x107   : > { %v601_v18 = vsel %vm594_vm12, %v597_v17, %v600_v53  ;;  %v370_v37 = vor.u32 4788187, %v369_v20  ;;  %v373_v2 = vcvt.s32.f32 %v366_v19 }
 0x108   : > { %v602_v22 = vsel %vm591_vm13, nan, %v601_v18 }
 0x109   : > { %606 = vst [vmem:[%s1205_s4 + $0x18] sm:$0xff] %v602_v22  ;;  %v371_v14 = vand.u32 2147483647, %v370_v37 }
 0x10b   : > { %v374_v5 = vmul.f32 %v373_v2, %v371_v14 }
 0x10d   : > { %v375_v30 = vxor.u32 2147483648, %v374_v5 }
 0x10f   : > { %v376_v31 = vsel %vm293_vm14, %v375_v30, %v374_v5 }
 0x110   : > { %v379_v24 = vsel %vm292_vm15, %v1047_v27, %v376_v31 }
 0x111   : > { %792 = vcosq.f32 %v379_v24 }
 0x112   : > { %794 = vsinq.f32 %v379_v24 }
 0x11e   : > { %v793_v28 = vpop.eup %792 }
 0x11f   : > { %v795_v35 = vpop.eup %794  ;;  %v391_v38 = vxor.u32 2147483648, %v793_v28 }
 0x120   : > { %v388_v6 = vxor.u32 2147483648, %v795_v35 }
 0x121   : > { %v392_v41 = vsel %vm390_vm0, %v391_v38, %v795_v35 }
 0x122   : > { %v389_v11 = vsel %vm387_vm1, %v793_v28, %v388_v6 }
 0x123   : > { %v393_v45 = vsel %vm386_vm2, %v389_v11, %v392_v41 }
 0x124   : > { %v394_v25 = vsel %vm383_vm3, nan, %v393_v45 }
 0x125   : > { %604 = vst [vmem:[%s1205_s4 + $0x8] sm:$0xff] %v394_v25 }
 0x126   : > { %809 = shalt.err (!%p806_p3)
}
 0x127   : > { %s810_s23 = scalar_lea.hbm %s1233_s14, 512  ;;  %s814_s26 = scalar_lea.hbm %s1283_s2, 1024 }
 0x128   : > { %p811_p4 = scmp.ne.s32.totalorder %s1233_s14, %s810_s23  ;;  %p815_p9 = scmp.lt.s32.totalorder %s1233_s14, %s1283_s2 }
 0x129   : > { %p816_p10 = scmp.lt.s32.totalorder %s814_s26, %s810_s23 }
 0x12a   : > { %p812_p7 = pnand %p811_p4, %p921_p5 }
 0x12b   : > { %p817_p11 = por %p816_p10, %p815_p9 }
 0x12c   : > { %p813_p8 = pneg %p812_p7 }
 0x12e   : > { %p818_p12 = pnand %p817_p11, %p813_p8 }
 0x130   : > { %821 = shalt.err (!%p818_p12)
}
 0x131   : > { %s866_s29 = smov 128   ;;  %s867_s30 = smov 8  }
 0x132   : > { %730 = dma.vmem_to_hbm [thread:$0]  (%p921_p5), %s1235_s6, 512, %s1233_s14, %s1241_s13, %s866_s29, %s866_s29, %s867_s30  }
 0x133 PF: > { %p736_p13 = scmp.ge.s32.totalorder %s856_s12, 2  ;;  %s636_s3 = sand.u32 1, %s844_s9  }
 0x134   : > { %s637_s4 = scalar_lea.sflag [#allocation3], %s636_s3 }
 0x135   : > { %p733_p0 = pnand %p736_p13, %p925_p6 }
 0x137   : > { %p734_p1 = pneg %p733_p0 }
 0x139   : > { %839 = dma.done.wait (%p734_p1), %s637_s4, 512  }
 0x13a   : > { %841 = vsyncadd (%p734_p1), %s637_s4, 4294966784  ;;  %p12_p2 = scmp.ge.s32.totalorder %s908_s15, 4   ;;  %s1290_s9 = smov %s848_s10 }
 0x13b   : > { %s1291_s10 = smov %s852_s11  ;;  %s1292_s11 = smov %s919_s18 }
 0x13c   : > { %s1293_s12 = smov %s908_s15  ;;  %14 = sbr.rel (!%p12_p2) target bundleno = 3 (0x3), region = 63 }
 0x141   :  { %642 = vsyncpa [#allocation3], 1 }
 0x142   :  { %644 = vsyncpa [#allocation3 + $0x1], 1 }

</bundles_post_ra>
